<compile_context>
chip_gen: v5e
topology: v5e:2x2
jax: 0.10.0
libtpu: 0.0.40
codegen_flags: <defaults>
</compile_context>

<pallas_src>
import math
import numpy as np
import jax
import jax.numpy as jnp
from jax.experimental import pallas as pl
from jax.experimental.pallas import tpu as pltpu

# ----------------------------------------------------------------------------
# Static irreps configuration (small synthetic shapes).
# node_irreps = "8x0e + 8x1o + 4x2e"
NODE_IRREPS = ((8, 0), (8, 1), (4, 2))        # (multiplicity, degree l)
NODE_DIM = 32                                  # invariant feature dim
NUM_IRREPS = sum(m for m, _ in NODE_IRREPS)            # 20
IRREPS_DIM = sum(m * (2 * l + 1) for m, l in NODE_IRREPS)  # 52
CONCAT_DIM = NODE_DIM + NUM_IRREPS                     # 52
PAD_DIM = 128                                  # lane-dense padded width
PACK_DIM = NODE_DIM + IRREPS_DIM               # 84 useful lanes
EPS = 1e-5


def _build_irrep_matrices():
    """Scatter / averaging matrices encoding the irrep block structure."""
    mavg = np.zeros((IRREPS_DIM, len(NODE_IRREPS)), np.float32)  # block comp. mean
    bblk = np.zeros((len(NODE_IRREPS), IRREPS_DIM), np.float32)  # block -> components
    pdot = np.zeros((IRREPS_DIM, NUM_IRREPS), np.float32)        # per-channel dot
    bchan = np.zeros((NUM_IRREPS, IRREPS_DIM), np.float32)       # channel -> components
    e_off, u_off = 0, 0
    for b, (mul, l) in enumerate(NODE_IRREPS):
        d = 2 * l + 1
        blk = slice(e_off, e_off + mul * d)
        mavg[blk, b] = 1.0 / (mul * d)
        bblk[b, blk] = 1.0
        for c in range(mul):
            u = u_off + c
            ch = slice(e_off + c * d, e_off + (c + 1) * d)
            # e3nn l (x) l -> 0e dot product carries a 1/sqrt(2l+1) factor.
            pdot[ch, u] = 1.0 / math.sqrt(d)
            bchan[u, ch] = 1.0
        e_off += mul * d
        u_off += mul
    return (jnp.asarray(mavg), jnp.asarray(bblk),
            jnp.asarray(pdot), jnp.asarray(bchan))


# ----------------------------------------------------------------------------
# Pallas kernel: one node-tile per grid step, all weights resident in VMEM.
def _interaction_kernel(xs_ref, xe_ref, vec_ref, w1_ref, w2_ref, os_ref, oe_ref):
    xs = xs_ref[...]                                   # [TN, 32]
    xe = xe_ref[...]                                   # [TN, 52]
    vec = vec_ref[...]                                 # [8, 128] parameter slab
    ln_w = vec[0:1, :NODE_DIM]
    ln_b = vec[1:2, :NODE_DIM]
    eln_w = vec[2:3, :IRREPS_DIM]
    b1 = vec[3:4, :]                                   # [1, 128] (col-packed)
    b2 = vec[4:5, :]                                   # [1, 128] (col-packed)

    # --- scalar LayerNorm (self.norm) ---
    mu = jnp.mean(xs, axis=-1, keepdims=True)
    xc = xs - mu
    var = jnp.mean(xc * xc, axis=-1, keepdims=True)
    s_n = xc * jax.lax.rsqrt(var + EPS) * ln_w + ln_b

    # --- EquivariantLayerNorm (self.o3norm): per-irrep-block component RMS,
    #     per-channel affine weight, done on the VPU with static lane masks
    #     (no degenerate 3-lane MXU matmuls).
    # TODO(synk): xequinet's exact EquivariantLayerNorm convention may differ
    # slightly (norm- vs component-normalization); this is component-RMS.
    sq = xe * xe
    lane = jax.lax.broadcasted_iota(jnp.int32, (1, IRREPS_DIM), 1)
    rinv_full = None
    off = 0
    for (mul, l) in NODE_IRREPS:
        width = mul * (2 * l + 1)
        maskf = ((lane >= off) & (lane < off + width)).astype(jnp.float32)   # [1, 52]
        blk_ms = jnp.sum(sq * maskf, axis=-1, keepdims=True) * (1.0 / width)  # [TN, 1]
        contrib = jax.lax.rsqrt(blk_ms + EPS) * maskf                         # [TN, 52]
        rinv_full = contrib if rinv_full is None else rinv_full + contrib
        off += width
    e_n = xe * rinv_full * eln_w

    # --- fused 2-layer MLP: one [TN,128] @ [128,128] matmul per layer.
    # W1 already contains the EquivariantDot projection (pdot) fused in; the
    # activation is the lane-dense pack [s_n | e_n*e_n | 0].
    tn = xs.shape[0]
    act = jnp.concatenate(
        [s_n, e_n * e_n, jnp.zeros((tn, PAD_DIM - PACK_DIM), jnp.float32)], axis=-1)
    h = jnp.dot(act, w1_ref[...], preferred_element_type=jnp.float32) + b1
    h = h * jax.nn.sigmoid(h)                           # SiLU
    mix = jnp.dot(h, w2_ref[...], preferred_element_type=jnp.float32) + b2
    # W2/b2 are column-packed, so mix = [d_scalar (0:32) | gate_full (32:84) | 0].

    os_ref[...] = xs + mix[:, :NODE_DIM]
    oe_ref[...] = xe + e_n * mix[:, NODE_DIM:PACK_DIM]


# ----------------------------------------------------------------------------
def _choose_tile(n, cap=1024, min_steps=4):
    """Pick a node tile: >= min_steps grid steps (>=2 per TC on v7x's 2-core
    chips) but capped so blocks stay small vs. the v7x 32 MiB scoped VMEM;
    on single-TC v5e/v6e the extra per-step overhead is negligible."""
    t = min(cap, max(8, pl.cdiv(n, min_steps)))
    return ((t + 7) // 8) * 8                           # sublane-align


def _pack_weights(params):
    """Consolidate all parameters into three aligned VMEM-resident slabs."""
    _, _, pdot, bchan = _build_irrep_matrices()
    f32 = jnp.float32

    w1 = jnp.zeros((PAD_DIM, PAD_DIM), f32)
    w1 = w1.at[:NODE_DIM, :CONCAT_DIM].set(params["w1s"].astype(f32))
    w1 = w1.at[NODE_DIM:PACK_DIM, :CONCAT_DIM].set(
        jnp.dot(pdot, params["w1e"].astype(f32), preferred_element_type=f32))

    w2s = params["w2"].astype(f32)
    w2 = jnp.zeros((PAD_DIM, PAD_DIM), f32)
    w2 = w2.at[:CONCAT_DIM, :NODE_DIM].set(w2s[:, :NODE_DIM])
    # Fold the exact 0/1 channel->component scatter (bchan) into W2's columns.
    w2 = w2.at[:CONCAT_DIM, NODE_DIM:PACK_DIM].set(
        jnp.dot(w2s[:, NODE_DIM:], bchan, preferred_element_type=f32))

    b2 = params["b2"].reshape(-1).astype(f32)
    vec = jnp.zeros((8, PAD_DIM), f32)
    vec = vec.at[0, :NODE_DIM].set(params["ln_w"].reshape(-1).astype(f32))
    vec = vec.at[1, :NODE_DIM].set(params["ln_b"].reshape(-1).astype(f32))
    vec = vec.at[2, :IRREPS_DIM].set(params["eln_w"].reshape(-1).astype(f32))
    vec = vec.at[3, :CONCAT_DIM].set(params["b1"].reshape(-1).astype(f32))
    vec = vec.at[4, :NODE_DIM].set(b2[:NODE_DIM])
    vec = vec.at[4, NODE_DIM:PACK_DIM].set(
        jnp.dot(b2[NODE_DIM:], bchan, preferred_element_type=f32))
    return vec, w1, w2


def interaction_block(data, params, *, tile_n=None):
    """data: dict with 'node_invariant' [N, NODE_DIM], 'node_equivariant' [N, IRREPS_DIM]."""
    xs = data["node_invariant"].astype(jnp.float32)
    xe = data["node_equivariant"].astype(jnp.float32)
    n = xs.shape[0]

    if tile_n is None:
        tile_n = _choose_tile(n)
    n_pad = pl.cdiv(n, tile_n) * tile_n
    if n_pad != n:
        # Only when tile_n does not divide N; the common path has zero
        # wrapper-side repacking HBM passes.
        xs = jnp.pad(xs, ((0, n_pad - n), (0, 0)))
        xe = jnp.pad(xe, ((0, n_pad - n), (0, 0)))

    vec, w1, w2 = _pack_weights(params)

    def node_spec(d):
        return pl.BlockSpec((tile_n, d), lambda i: (i, 0))

    def full_spec(arr):
        return pl.BlockSpec(arr.shape, lambda i: (0,) * arr.ndim)

    out_s, out_e = pl.pallas_call(
        _interaction_kernel,
        out_shape=(jax.ShapeDtypeStruct((n_pad, NODE_DIM), jnp.float32),
                   jax.ShapeDtypeStruct((n_pad, IRREPS_DIM), jnp.float32)),
        grid_spec=pltpu.PrefetchScalarGridSpec(
            num_scalar_prefetch=0,
            grid=(n_pad // tile_n,),
            in_specs=[node_spec(NODE_DIM), node_spec(IRREPS_DIM),
                      full_spec(vec), full_spec(w1), full_spec(w2)],
            out_specs=[node_spec(NODE_DIM), node_spec(IRREPS_DIM)],
        ),
        compiler_params=pltpu.CompilerParams(
            dimension_semantics=("parallel",),
        ),
    )(xs, xe, vec, w1, w2)

    out = dict(data)
    out["node_invariant"] = out_s[:n] if n_pad != n else out_s
    out["node_equivariant"] = out_e[:n] if n_pad != n else out_e
    return out


# ----------------------------------------------------------------------------
# Pure-JAX reference (same math, unfused) for a correctness check.
def _reference(data, params):
    xs = data["node_invariant"]
    xe = data["node_equivariant"]
    mavg, bblk, pdot, bchan = _build_irrep_matrices()

    mu = jnp.mean(xs, -1, keepdims=True)
    xc = xs - mu
    var = jnp.mean(xc * xc, -1, keepdims=True)
    s_n = xc * jax.lax.rsqrt(var + EPS) * params["ln_w"] + params["ln_b"]

    blk_ms = (xe * xe) @ mavg
    rinv_full = jax.lax.rsqrt(blk_ms + EPS) @ bblk
    e_n = xe * rinv_full * params["eln_w"]

    inv = (e_n * e_n) @ pdot
    cat = jnp.concatenate([s_n, inv], axis=-1)
    w1 = jnp.concatenate([params["w1s"], params["w1e"]], axis=0)
    h = cat @ w1 + params["b1"]
    h = h * jax.nn.sigmoid(h)
    mix = h @ params["w2"] + params["b2"]
    d_scalar, x_gate = mix[:, :NODE_DIM], mix[:, NODE_DIM:]
    d_equi = e_n * (x_gate @ bchan)
    return xs + d_scalar, xe + d_equi


# ----------------------------------------------------------------------------
if __name__ == "__main__":
    key = jax.random.PRNGKey(0)
    N = 64
    ks = jax.random.split(key, 12)

    data = {
        "node_invariant": jax.random.normal(ks[0], (N, NODE_DIM), jnp.float32),
        "node_equivariant": jax.random.normal(ks[1], (N, IRREPS_DIM), jnp.float32),
    }

    def lin(k, fan_in, fan_out):
        return jax.random.normal(k, (fan_in, fan_out), jnp.float32) / math.sqrt(fan_in)

    # Deterministic synthetic parameters (shapes follow the module __init__).
    eln_w_chan = 1.0 + 0.1 * jax.random.normal(ks[2], (NUM_IRREPS,), jnp.float32)
    _, _, _, bchan = _build_irrep_matrices()
    params = {
        "ln_w": (1.0 + 0.1 * jax.random.normal(ks[3], (1, NODE_DIM), jnp.float32)),
        "ln_b": 0.05 * jax.random.normal(ks[4], (1, NODE_DIM), jnp.float32),
        "eln_w": (eln_w_chan @ bchan).reshape(1, IRREPS_DIM),   # per-channel -> per-component
        "w1s": lin(ks[5], NODE_DIM, CONCAT_DIM),                # rows of W1 for scalar part
        "w1e": lin(ks[6], NUM_IRREPS, CONCAT_DIM),              # rows of W1 for invariant part
        "b1": 0.05 * jax.random.normal(ks[7], (1, CONCAT_DIM), jnp.float32),
        "w2": lin(ks[8], CONCAT_DIM, CONCAT_DIM),
        "b2": 0.05 * jax.random.normal(ks[9], (1, CONCAT_DIM), jnp.float32),
    }

    out = interaction_block(data, params)
    jax.block_until_ready(out["node_invariant"])
    jax.block_until_ready(out["node_equivariant"])

    ref_s, ref_e = _reference(data, params)
    np.testing.assert_allclose(np.asarray(out["node_invariant"]), np.asarray(ref_s),
                               rtol=1e-5, atol=1e-5)
    np.testing.assert_allclose(np.asarray(out["node_equivariant"]), np.asarray(ref_e),
                               rtol=1e-5, atol=1e-5)

    print("KERNEL_OK")
</pallas_src>

<mosaic_0001>
module attributes {stable_mosaic.version = 11 : i64} {
  func.func @_interaction_kernel(%arg0: i32, %arg1: memref<16x32xf32, #tpu.memory_space<vmem>>, %arg2: memref<16x52xf32, #tpu.memory_space<vmem>>, %arg3: memref<8x128xf32, #tpu.memory_space<vmem>>, %arg4: memref<128x128xf32, #tpu.memory_space<vmem>>, %arg5: memref<128x128xf32, #tpu.memory_space<vmem>>, %arg6: memref<16x32xf32, #tpu.memory_space<vmem>>, %arg7: memref<16x52xf32, #tpu.memory_space<vmem>>) attributes {dimension_semantics = [#tpu.dimension_semantics<parallel>], iteration_bounds = array<i64: 4>, scalar_prefetch = 0 : i64, scratch_operands = 0 : i64, tpu.core_type = #tpu.core_type<tc>, window_params = [{transform_indices = @transform_0, window_bounds = array<i64: 16, 32>}, {transform_indices = @transform_1, window_bounds = array<i64: 16, 52>}, {pipeline_mode = #tpu.pipeline_mode<synchronous>, transform_indices = @transform_2, window_bounds = array<i64: 8, 128>}, {pipeline_mode = #tpu.pipeline_mode<synchronous>, transform_indices = @transform_3, window_bounds = array<i64: 128, 128>}, {pipeline_mode = #tpu.pipeline_mode<synchronous>, transform_indices = @transform_4, window_bounds = array<i64: 128, 128>}, {transform_indices = @transform_5, window_bounds = array<i64: 16, 32>}, {transform_indices = @transform_6, window_bounds = array<i64: 16, 52>}]} {
    %c0 = arith.constant 0 : index
    %c0_0 = arith.constant 0 : index
    %0 = vector.load %arg1[%c0, %c0_0] : memref<16x32xf32, #tpu.memory_space<vmem>>, vector<16x32xf32>
    %c0_1 = arith.constant 0 : index
    %c0_2 = arith.constant 0 : index
    %1 = vector.load %arg2[%c0_1, %c0_2] : memref<16x52xf32, #tpu.memory_space<vmem>>, vector<16x52xf32>
    %c0_3 = arith.constant 0 : index
    %c0_4 = arith.constant 0 : index
    %2 = vector.load %arg3[%c0_3, %c0_4] : memref<8x128xf32, #tpu.memory_space<vmem>>, vector<8x128xf32>
    %3 = vector.extract_strided_slice %2 {offsets = [0, 0], sizes = [1, 32], strides = [1, 1]} : vector<8x128xf32> to vector<1x32xf32>
    %4 = vector.extract_strided_slice %2 {offsets = [1, 0], sizes = [1, 32], strides = [1, 1]} : vector<8x128xf32> to vector<1x32xf32>
    %5 = vector.extract_strided_slice %2 {offsets = [2, 0], sizes = [1, 52], strides = [1, 1]} : vector<8x128xf32> to vector<1x52xf32>
    %6 = vector.extract_strided_slice %2 {offsets = [3, 0], sizes = [1, 128], strides = [1, 1]} : vector<8x128xf32> to vector<1x128xf32>
    %7 = vector.extract_strided_slice %2 {offsets = [4, 0], sizes = [1, 128], strides = [1, 1]} : vector<8x128xf32> to vector<1x128xf32>
    %cst = arith.constant dense<0.000000e+00> : vector<16xf32>
    %8 = vector.multi_reduction <add>, %0, %cst [1] : vector<16x32xf32> to vector<16xf32>
    %9 = vector.shape_cast %8 : vector<16xf32> to vector<16x1xf32>
    %cst_5 = arith.constant 3.200000e+01 : f32
    %10 = vector.broadcast %cst_5 : f32 to vector<16x1xf32>
    %11 = arith.divf %9, %10 : vector<16x1xf32>
    %12 = vector.broadcast %11 : vector<16x1xf32> to vector<16x32xf32>
    %13 = arith.subf %0, %12 : vector<16x32xf32>
    %14 = arith.mulf %13, %13 : vector<16x32xf32>
    %cst_6 = arith.constant dense<0.000000e+00> : vector<16xf32>
    %15 = vector.multi_reduction <add>, %14, %cst_6 [1] : vector<16x32xf32> to vector<16xf32>
    %16 = vector.shape_cast %15 : vector<16xf32> to vector<16x1xf32>
    %cst_7 = arith.constant 3.200000e+01 : f32
    %17 = vector.broadcast %cst_7 : f32 to vector<16x1xf32>
    %18 = arith.divf %16, %17 : vector<16x1xf32>
    %cst_8 = arith.constant 9.99999974E-6 : f32
    %19 = vector.broadcast %cst_8 : f32 to vector<16x1xf32>
    %20 = arith.addf %18, %19 : vector<16x1xf32>
    %21 = math.rsqrt %20 : vector<16x1xf32>
    %22 = vector.broadcast %21 : vector<16x1xf32> to vector<16x32xf32>
    %23 = arith.mulf %13, %22 : vector<16x32xf32>
    %24 = vector.broadcast %3 : vector<1x32xf32> to vector<16x32xf32>
    %25 = arith.mulf %23, %24 : vector<16x32xf32>
    %26 = vector.broadcast %4 : vector<1x32xf32> to vector<16x32xf32>
    %27 = arith.addf %25, %26 : vector<16x32xf32>
    %28 = arith.mulf %1, %1 : vector<16x52xf32>
    %29 = tpu.iota {dimensions = array<i32: 1>} : vector<1x52xi32>
    %c0_i32 = arith.constant 0 : i32
    %30 = vector.broadcast %c0_i32 : i32 to vector<1x52xi32>
    %31 = arith.cmpi sge, %29, %30 : vector<1x52xi32>
    %c8_i32 = arith.constant 8 : i32
    %32 = vector.broadcast %c8_i32 : i32 to vector<1x52xi32>
    %33 = arith.cmpi slt, %29, %32 : vector<1x52xi32>
    %34 = arith.andi %31, %33 : vector<1x52xi1>
    %35 = arith.extui %34 : vector<1x52xi1> to vector<1x52xi32>
    %36 = arith.sitofp %35 : vector<1x52xi32> to vector<1x52xf32>
    %37 = vector.broadcast %36 : vector<1x52xf32> to vector<16x52xf32>
    %38 = arith.mulf %28, %37 : vector<16x52xf32>
    %cst_9 = arith.constant dense<0.000000e+00> : vector<16xf32>
    %39 = vector.multi_reduction <add>, %38, %cst_9 [1] : vector<16x52xf32> to vector<16xf32>
    %40 = vector.shape_cast %39 : vector<16xf32> to vector<16x1xf32>
    %cst_10 = arith.constant 1.250000e-01 : f32
    %41 = vector.broadcast %cst_10 : f32 to vector<16x1xf32>
    %42 = arith.mulf %40, %41 : vector<16x1xf32>
    %cst_11 = arith.constant 9.99999974E-6 : f32
    %43 = vector.broadcast %cst_11 : f32 to vector<16x1xf32>
    %44 = arith.addf %42, %43 : vector<16x1xf32>
    %45 = math.rsqrt %44 : vector<16x1xf32>
    %46 = vector.broadcast %45 : vector<16x1xf32> to vector<16x52xf32>
    %47 = vector.broadcast %36 : vector<1x52xf32> to vector<16x52xf32>
    %48 = arith.mulf %46, %47 : vector<16x52xf32>
    %c8_i32_12 = arith.constant 8 : i32
    %49 = vector.broadcast %c8_i32_12 : i32 to vector<1x52xi32>
    %50 = arith.cmpi sge, %29, %49 : vector<1x52xi32>
    %c32_i32 = arith.constant 32 : i32
    %51 = vector.broadcast %c32_i32 : i32 to vector<1x52xi32>
    %52 = arith.cmpi slt, %29, %51 : vector<1x52xi32>
    %53 = arith.andi %50, %52 : vector<1x52xi1>
    %54 = arith.extui %53 : vector<1x52xi1> to vector<1x52xi32>
    %55 = arith.sitofp %54 : vector<1x52xi32> to vector<1x52xf32>
    %56 = vector.broadcast %55 : vector<1x52xf32> to vector<16x52xf32>
    %57 = arith.mulf %28, %56 : vector<16x52xf32>
    %cst_13 = arith.constant dense<0.000000e+00> : vector<16xf32>
    %58 = vector.multi_reduction <add>, %57, %cst_13 [1] : vector<16x52xf32> to vector<16xf32>
    %59 = vector.shape_cast %58 : vector<16xf32> to vector<16x1xf32>
    %cst_14 = arith.constant 0.0416666679 : f32
    %60 = vector.broadcast %cst_14 : f32 to vector<16x1xf32>
    %61 = arith.mulf %59, %60 : vector<16x1xf32>
    %cst_15 = arith.constant 9.99999974E-6 : f32
    %62 = vector.broadcast %cst_15 : f32 to vector<16x1xf32>
    %63 = arith.addf %61, %62 : vector<16x1xf32>
    %64 = math.rsqrt %63 : vector<16x1xf32>
    %65 = vector.broadcast %64 : vector<16x1xf32> to vector<16x52xf32>
    %66 = vector.broadcast %55 : vector<1x52xf32> to vector<16x52xf32>
    %67 = arith.mulf %65, %66 : vector<16x52xf32>
    %68 = arith.addf %48, %67 : vector<16x52xf32>
    %c32_i32_16 = arith.constant 32 : i32
    %69 = vector.broadcast %c32_i32_16 : i32 to vector<1x52xi32>
    %70 = arith.cmpi sge, %29, %69 : vector<1x52xi32>
    %c52_i32 = arith.constant 52 : i32
    %71 = vector.broadcast %c52_i32 : i32 to vector<1x52xi32>
    %72 = arith.cmpi slt, %29, %71 : vector<1x52xi32>
    %73 = arith.andi %70, %72 : vector<1x52xi1>
    %74 = arith.extui %73 : vector<1x52xi1> to vector<1x52xi32>
    %75 = arith.sitofp %74 : vector<1x52xi32> to vector<1x52xf32>
    %76 = vector.broadcast %75 : vector<1x52xf32> to vector<16x52xf32>
    %77 = arith.mulf %28, %76 : vector<16x52xf32>
    %cst_17 = arith.constant dense<0.000000e+00> : vector<16xf32>
    %78 = vector.multi_reduction <add>, %77, %cst_17 [1] : vector<16x52xf32> to vector<16xf32>
    %79 = vector.shape_cast %78 : vector<16xf32> to vector<16x1xf32>
    %cst_18 = arith.constant 5.000000e-02 : f32
    %80 = vector.broadcast %cst_18 : f32 to vector<16x1xf32>
    %81 = arith.mulf %79, %80 : vector<16x1xf32>
    %cst_19 = arith.constant 9.99999974E-6 : f32
    %82 = vector.broadcast %cst_19 : f32 to vector<16x1xf32>
    %83 = arith.addf %81, %82 : vector<16x1xf32>
    %84 = math.rsqrt %83 : vector<16x1xf32>
    %85 = vector.broadcast %84 : vector<16x1xf32> to vector<16x52xf32>
    %86 = vector.broadcast %75 : vector<1x52xf32> to vector<16x52xf32>
    %87 = arith.mulf %85, %86 : vector<16x52xf32>
    %88 = arith.addf %68, %87 : vector<16x52xf32>
    %89 = arith.mulf %1, %88 : vector<16x52xf32>
    %90 = vector.broadcast %5 : vector<1x52xf32> to vector<16x52xf32>
    %91 = arith.mulf %89, %90 : vector<16x52xf32>
    %92 = arith.mulf %91, %91 : vector<16x52xf32>
    %cst_20 = arith.constant 0.000000e+00 : f32
    %93 = vector.broadcast %cst_20 : f32 to vector<16x44xf32>
    %94 = tpu.concatenate %27, %92, %93 in 1 : vector<16x32xf32>, vector<16x52xf32>, vector<16x44xf32> -> vector<16x128xf32>
    %c0_21 = arith.constant 0 : index
    %c0_22 = arith.constant 0 : index
    %95 = vector.load %arg4[%c0_21, %c0_22] : memref<128x128xf32, #tpu.memory_space<vmem>>, vector<128x128xf32>
    %cst_23 = arith.constant dense<0.000000e+00> : vector<16x128xf32>
    %96 = tpu.matmul %94, %95, %cst_23 {dimension_numbers = #tpu.dot_dimension_numbers<[1], [0], [0], [1], [0, 0, 1, 1], [], []>} : vector<16x128xf32>, vector<128x128xf32>, vector<16x128xf32> -> vector<16x128xf32>
    %97 = vector.broadcast %6 : vector<1x128xf32> to vector<16x128xf32>
    %98 = arith.addf %96, %97 : vector<16x128xf32>
    %99 = arith.negf %98 : vector<16x128xf32>
    %100 = math.exp %99 : vector<16x128xf32>
    %cst_24 = arith.constant 1.000000e+00 : f32
    %101 = vector.broadcast %cst_24 : f32 to vector<16x128xf32>
    %102 = arith.addf %101, %100 : vector<16x128xf32>
    %103 = arith.divf %101, %102 : vector<16x128xf32>
    %104 = arith.mulf %98, %103 : vector<16x128xf32>
    %c0_25 = arith.constant 0 : index
    %c0_26 = arith.constant 0 : index
    %105 = vector.load %arg5[%c0_25, %c0_26] : memref<128x128xf32, #tpu.memory_space<vmem>>, vector<128x128xf32>
    %cst_27 = arith.constant dense<0.000000e+00> : vector<16x128xf32>
    %106 = tpu.matmul %104, %105, %cst_27 {dimension_numbers = #tpu.dot_dimension_numbers<[1], [0], [0], [1], [0, 0, 1, 1], [], []>} : vector<16x128xf32>, vector<128x128xf32>, vector<16x128xf32> -> vector<16x128xf32>
    %107 = vector.broadcast %7 : vector<1x128xf32> to vector<16x128xf32>
    %108 = arith.addf %106, %107 : vector<16x128xf32>
    %109 = vector.extract_strided_slice %108 {offsets = [0, 0], sizes = [16, 32], strides = [1, 1]} : vector<16x128xf32> to vector<16x32xf32>
    %110 = arith.addf %0, %109 : vector<16x32xf32>
    %c0_28 = arith.constant 0 : index
    %c0_29 = arith.constant 0 : index
    %111 = vector.load %arg6[%c0_28, %c0_29] : memref<16x32xf32, #tpu.memory_space<vmem>>, vector<16x32xf32>
    tpu.vector_store %arg6[%c0_28, %c0_29], %110 {strides = array<i32>} : memref<16x32xf32, #tpu.memory_space<vmem>>, vector<16x32xf32>,
    %112 = vector.extract_strided_slice %108 {offsets = [0, 32], sizes = [16, 52], strides = [1, 1]} : vector<16x128xf32> to vector<16x52xf32>
    %113 = arith.mulf %91, %112 : vector<16x52xf32>
    %114 = arith.addf %1, %113 : vector<16x52xf32>
    %c0_30 = arith.constant 0 : index
    %c0_31 = arith.constant 0 : index
    %115 = vector.load %arg7[%c0_30, %c0_31] : memref<16x52xf32, #tpu.memory_space<vmem>>, vector<16x52xf32>
    tpu.vector_store %arg7[%c0_30, %c0_31], %114 {strides = array<i32>} : memref<16x52xf32, #tpu.memory_space<vmem>>, vector<16x52xf32>,
    return
  }
  func.func @transform_0(%arg0: i32) -> (i32, i32) {
    %c0_i32 = arith.constant 0 : i32
    %c0_i32_0 = arith.constant 0 : i32
    return %arg0, %c0_i32 : i32, i32
  }
  func.func @transform_1(%arg0: i32) -> (i32, i32) {
    %c0_i32 = arith.constant 0 : i32
    %c0_i32_0 = arith.constant 0 : i32
    return %arg0, %c0_i32 : i32, i32
  }
  func.func @transform_2(%arg0: i32) -> (i32, i32) {
    %c0_i32 = arith.constant 0 : i32
    %c0_i32_0 = arith.constant 0 : i32
    %c0_i32_1 = arith.constant 0 : i32
    return %c0_i32, %c0_i32_0 : i32, i32
  }
  func.func @transform_3(%arg0: i32) -> (i32, i32) {
    %c0_i32 = arith.constant 0 : i32
    %c0_i32_0 = arith.constant 0 : i32
    %c0_i32_1 = arith.constant 0 : i32
    return %c0_i32, %c0_i32_0 : i32, i32
  }
  func.func @transform_4(%arg0: i32) -> (i32, i32) {
    %c0_i32 = arith.constant 0 : i32
    %c0_i32_0 = arith.constant 0 : i32
    %c0_i32_1 = arith.constant 0 : i32
    return %c0_i32, %c0_i32_0 : i32, i32
  }
  func.func @transform_5(%arg0: i32) -> (i32, i32) {
    %c0_i32 = arith.constant 0 : i32
    %c0_i32_0 = arith.constant 0 : i32
    return %arg0, %c0_i32 : i32, i32
  }
  func.func @transform_6(%arg0: i32) -> (i32, i32) {
    %c0_i32 = arith.constant 0 : i32
    %c0_i32_0 = arith.constant 0 : i32
    return %arg0, %c0_i32 : i32, i32
  }
}

</mosaic_0001>

<bundles_post_ra>
// kernel: tpu_custom_call.1
= control target key start
LH: loop header
LB: loop body
LE: loop exit
PB: predicated region body
PF: predicated region fallthrough
CT: control target
= control target key end

     0   :  { %12 = vsyncpa [#allocation3], 0  ;;  %s960_s21 = smov 0   ;;  %s1148_s0 = inlined_call_operand.vmem [shape: f32[64,32], index: 0, kind: input, shape index: {}]   ;;  %s1149_s1 = inlined_call_operand.vmem [shape: f32[64,52], index: 1, kind: input, shape index: {}]   ;;  %s1150_s2 = inlined_call_operand.vmem [shape: f32[8,128], index: 2, kind: input, shape index: {}]   ;;  %s1151_s3 = inlined_call_operand.vmem [shape: f32[128,128], index: 3, kind: input, shape index: {}]   ;;  %s1152_s4 = inlined_call_operand.hbm [shape: f32[128,128], index: 4, kind: input, shape index: {}]   ;;  %s1153_s5 = inlined_call_operand.vmem [shape: f32[64,32], index: 5, kind: output, shape index: {0}]   ;;  %s1154_s6 = inlined_call_operand.vmem [shape: f32[64,52], index: 6, kind: output, shape index: {1}]  }
   0x1 LB: > { %s207_s24 = sshll.u32 %s1152_s4, 4  ;;  %s769_s25 = sadd.s32 4294967295, %s916_s21   ;;  %s916_s21 = sphi %s960_s21, %s18_s21   ;;  %s208_s24 = int_to_ptr.hbm [resolvable:$true] %s207_s24 }
   0x2   : > { %p771_p0 = scmp.ge.s32.totalorder %s916_s21, 1  ;;  %p190_p1 = scmp.lt.s32.totalorder %s916_s21, 5 }
   0x3   : > { %p833_p2 = scmp.eq.s32.totalorder %s769_s25, 0  ;;  %s918_s26 = smov [#allocation2]  }
   0x4   : > { %p191_p3 = pnand %p771_p0, %p190_p1  ;;  %s209_s27 = sshll.u32 %s918_s26, 4  ;;  %s210_s27 = int_to_ptr.vmem [resolvable:$true] %s209_s27 }
   0x5   : > { %s919_s28 = smov 128   ;;  %s920_s29 = smov 8  }
   0x6   : > { %p829_p4 = pneg %p191_p3  ;;  %243 = sbr.rel (%p191_p3) target bundleno = 694 (0x2b6), region = 40 }
   0x8   : > { %p830_p5 = pnand %p833_p2, %p829_p4 }
   0xa   : > { %832 = dma.hbm_to_vmem [thread:$0]  (!%p830_p5), %s208_s24, 2048, %s210_s27, [#allocation3], %s919_s28, %s919_s28, %s920_s29  }
   0xb   : > { %911 = dma.done.wait (%p833_p2), [#allocation3], 2048  }
   0xc   : > { %913 = vsyncadd (%p833_p2), [#allocation3], 4294965248  ;;  %s776_s30 = sshll.u32 %s769_s25, 1  ;;  %v373_v0 = vlaneseq  ;;  %vm313_vm2 = vcmask 261120   ;;  %v921_v7 = vmov 0.0   ;;  %vm382_vm8 = vcmask 424960  }
   0xd   : > { %p285_p6 = scmp.lt.s32.totalorder %s776_s30, 7  ;;  %v922_v26 = vmov 32.0   ;;  %s923_s18 = smov 32  }
   0xe   : > { %v374_v1 = vand.u32 127, %v373_v0  ;;  %850 = vrcp.f32 %v922_v26  ;;  %s924_s8 = smov 96  }
   0xf   : > { %s1156_s30 = smov (!%p285_p6, %s776_s30), 7 }
  0x10   : > { %vm415_vm0 = vcmp.ge.s32.totalorder %v374_v1, 8  ;;  %vm416_vm1 = vcmp.lt.s32.totalorder %v374_v1, 32  ;;  %s971_s7 = sshll.u32 %s1156_s30, 3  ;;  %vm376_vm4 = vcmp.lt.s32.totalorder %v374_v1, 8  ;;  %vm456_vm5 = vcmp.ge.s32.totalorder %v374_v1, 32 }
  0x11   : > { %vm417_vm3 = vmand %vm415_vm0, %vm416_vm1  ;;  %s288_s10 = scalar_lea.vmem %s1148_s0, %s971_s7  ;;  %vm457_vm6 = vcmp.lt.s32.totalorder %v374_v1, 52  ;;  %s294_s13 = scalar_lea.vmem %s1149_s1, %s971_s7  ;;  %v993_v9 = vsel %vm376_vm4, 1.0, %v921_v7 }
  0x12   : > { %v977_v2 = vld [vmem:[%s288_s10 + $0x8] sm:$0xff]  ;;  %v979_v3 = vld [vmem:[%s288_s10] sm:$0xff]  ;;  %v991_v8 = vsel %vm417_vm3, 1.0, %v921_v7  ;;  %vm458_vm7 = vmand %vm456_vm5, %vm457_vm6  ;;  %s300_s30 = scalar_lea.vmem %s1153_s5, %s971_s7  ;;  %s306_s11 = scalar_lea.vmem %s1154_s6, %s971_s7 }
  0x13   : > { %v317_v4 = vsel %vm313_vm2, %v977_v2, 0.0  ;;  %v314_v5 = vsel %vm313_vm2, %v979_v3, 0.0  ;;  %v989_v6 = vld [vmem:[%s294_s13 + $0x8] sm:$0xff]  ;;  %v995_v10 = vld [vmem:[%s294_s13] sm:$0xff]  ;;  %v1006_v16 = vsel %vm458_vm7, 1.0, %v921_v7 }
  0x14   : > { %318 = vadd.xlane.f32.xlu0 %v317_v4  ;;  %315 = vadd.xlane.f32.xlu2 %v314_v5  ;;  %v372_v11 = vmul.f32 %v989_v6, %v989_v6  ;;  %v371_v12 = vmul.f32 %v995_v10, %v995_v10  ;;  %v851_v27 = vpop.eup %850 }
  0x15   : > { %v321_v28 = vmul.f32 32.0, %v851_v27  ;;  %vm325_vm9 = vweird.f32 %v851_v27 }
  0x16   : > { %v421_v13 = vmul.f32 %v991_v8, %v372_v11  ;;  %v381_v14 = vmul.f32 %v993_v9, %v372_v11  ;;  %v380_v15 = vmul.f32 %v993_v9, %v371_v12  ;;  %v462_v20 = vmul.f32 %v1006_v16, %v372_v11  ;;  %v532_v11 = vld [vmem:[%s1151_s3 + $0x78] sm:$0xff] }
  0x17   : > { %v420_v21 = vmul.f32 %v991_v8, %v371_v12  ;;  %v461_v24 = vmul.f32 %v1006_v16, %v371_v12  ;;  %v322_v29 = vsub.f32 1.0, %v321_v28  ;;  %534 = vmatpush.msra.mxu0 %v532_v11  ;;  %793 = vmatpush.msra.mxu2 %v532_v11  ;;  %v527_v11 = vld [vmem:[%s1151_s3 + $0x50] sm:$0xff] }
  0x18   : > { %v425_v17 = vsel %vm382_vm8, %v421_v13, 0.0  ;;  %v386_v18 = vsel %vm382_vm8, %v381_v14, 0.0  ;;  %v383_v19 = vsel %vm382_vm8, %v380_v15, 0.0  ;;  %v466_v22 = vsel %vm382_vm8, %v462_v20, 0.0 }
  0x19   : > { %426 = vadd.xlane.f32.xlu1 %v425_v17  ;;  %v422_v23 = vsel %vm382_vm8, %v420_v21, 0.0  ;;  %v463_v25 = vsel %vm382_vm8, %v461_v24, 0.0  ;;  %v323_v30 = vmul.f32 %v851_v27, %v322_v29 }
  0x1b   : > { %v324_v31 = vadd.f32 %v851_v27, %v323_v30 }
  0x1c   : > { %387 = vadd.xlane.f32.xlu0 %v386_v18  ;;  %384 = vadd.xlane.f32.xlu2 %v383_v19 }
  0x1d   : > { %v1017_v32 = vsel %vm325_vm9, %v851_v27, %v324_v31 }
  0x21   : > { %467 = vadd.xlane.f32.xlu1 %v466_v22 }
  0x24   : > { %423 = vadd.xlane.f32.xlu0 %v422_v23 }
  0x29   : > { %464 = vadd.xlane.f32.xlu1 %v463_v25 }
  0x87   : > { %v319_v33 = vpop.xlane.xlu0 %318  ;;  %v316_v34 = vpop.xlane.xlu2 %315 }
  0x88   : > { %v328_v35 = vmul.f32 %v1017_v32, %v319_v33  ;;  %v327_v36 = vmul.f32 %v1017_v32, %v316_v34 }
  0x8a   : > { %v1022_v37 = vsub.f32 %v977_v2, %v328_v35  ;;  %v1025_v38 = vsub.f32 %v979_v3, %v327_v36 }
  0x8c   : > { %v427_v39 = vpop.xlane.xlu1 %426  ;;  %v332_v40 = vmul.f32 %v1022_v37, %v1022_v37  ;;  %v331_v41 = vmul.f32 %v1025_v38, %v1025_v38 }
  0x8d   : > { %v429_v42 = vmul.f32 0.041666668, %v427_v39 }
  0x8e   : > { %v336_v43 = vsel %vm313_vm2, %v332_v40, 0.0  ;;  %v333_v44 = vsel %vm313_vm2, %v331_v41, 0.0 }
  0x8f   : > { %v431_v45 = vadd.f32 1e-05, %v429_v42  ;;  %v388_v46 = vpop.xlane.xlu0 %387  ;;  %337 = vadd.xlane.f32.xlu2 %v336_v43  ;;  %334 = vadd.xlane.f32.xlu0 %v333_v44  ;;  %v385_v47 = vpop.xlane.xlu2 %384 }
  0x90   : > { %v390_v48 = vmul.f32 0.125, %v388_v46  ;;  %v389_v49 = vmul.f32 0.125, %v385_v47 }
  0x91   : > { %852 = vrsqrt.f32 %v431_v45  ;;  %vm448_vm13 = vweird.f32 %v431_v45 }
  0x92   : > { %v392_v50 = vadd.f32 1e-05, %v390_v48  ;;  %v1033_v51 = vadd.f32 1e-05, %v389_v49 }
  0x94   : > { %854 = vrsqrt.f32 %v392_v50  ;;  %v468_v52 = vpop.xlane.xlu1 %467  ;;  %vm409_vm10 = vweird.f32 %v392_v50  ;;  %vm399_vm1 = vweird.f32 %v1033_v51 }
  0x95   : > { %856 = vrsqrt.f32 %v1033_v51  ;;  %v470_v53 = vmul.f32 0.05, %v468_v52 }
  0x97   : > { %v853_v54 = vpop.eup %852  ;;  %v472_v55 = vadd.f32 1e-05, %v470_v53  ;;  %v424_v56 = vpop.xlane.xlu0 %423 }
  0x98   : > { %v443_v57 = vmul.f32 %v853_v54, %v431_v45  ;;  %v428_v58 = vmul.f32 0.041666668, %v424_v56  ;;  %vm449_vm12 = vweird.f32 %v853_v54  ;;  %v1052_v45 = vld [vmem:[%s1150_s2] sm:$0xff] }
  0x99   : > { %858 = vrsqrt.f32 %v472_v55  ;;  %vm450_vm15 = vmor %vm448_vm13, %vm449_vm12  ;;  %vm489_vm4 = vweird.f32 %v472_v55  ;;  %v499_v53 = vperm.slane %v1052_v45, 2 }
  0x9a   : > { %v855_v59 = vpop.eup %854  ;;  %v444_v60 = vmul.f32 %v853_v54, %v443_v57  ;;  %v430_v61 = vadd.f32 1e-05, %v428_v58 }
  0x9b   : > { %v1036_v62 = vpop.eup %856  ;;  %v404_v63 = vmul.f32 %v855_v59, %v392_v50  ;;  %vm410_vm11 = vweird.f32 %v855_v59 }
  0x9c   : > { %v445_v0 = vmul.f32 0.5, %v444_v60  ;;  %v394_v1 = vmul.f32 %v1036_v62, %v1033_v51  ;;  %860 = vrsqrt.f32 %v430_v61  ;;  %v465_v4 = vpop.xlane.xlu1 %464  ;;  %vm411_vm14 = vmor %vm409_vm10, %vm410_vm11  ;;  %vm400_vm3 = vweird.f32 %v1036_v62 }
  0x9d   : > { %v405_v5 = vmul.f32 %v855_v59, %v404_v63  ;;  %v469_v7 = vmul.f32 0.05, %v465_v4  ;;  %vm438_vm6 = vweird.f32 %v430_v61  ;;  %vm401_vm9 = vmor %vm399_vm1, %vm400_vm3  ;;  %v531_v4 = vld [vmem:[%s1151_s3 + $0x70] sm:$0xff] }
  0x9e   : > { %v446_v12 = vsub.f32 1.5, %v445_v0  ;;  %v395_v13 = vmul.f32 %v1036_v62, %v394_v1  ;;  %535 = vmatpush.msra.mxu0 %v531_v4  ;;  %794 = vmatpush.msra.mxu2 %v531_v4  ;;  %v602_v4 = vld [vmem:[#allocation2 + $0x28] sm:$0xff] }
  0x9f   : > { %v859_v14 = vpop.eup %858  ;;  %v406_v15 = vmul.f32 0.5, %v405_v5  ;;  %v471_v17 = vadd.f32 1e-05, %v469_v7  ;;  %v529_v5 = vld [vmem:[%s1151_s3 + $0x60] sm:$0xff]  ;;  %v528_v7 = vld [vmem:[%s1151_s3 + $0x58] sm:$0xff] }
  0xa0   : > { %v484_v18 = vmul.f32 %v859_v14, %v472_v55  ;;  %v447_v21 = vmul.f32 %v853_v54, %v446_v12  ;;  %v396_v22 = vmul.f32 0.5, %v395_v13  ;;  %vm490_vm0 = vweird.f32 %v859_v14  ;;  %v526_v12 = vld [vmem:[%s1151_s3 + $0x48] sm:$0xff]  ;;  %v525_v13 = vld [vmem:[%s1151_s3 + $0x40] sm:$0xff] }
  0xa1   : > { %v407_v19 = vsub.f32 1.5, %v406_v15  ;;  %862 = vrsqrt.f32 %v471_v17  ;;  %vm491_vm5 = vmor %vm489_vm4, %vm490_vm0  ;;  %vm479_vm11 = vweird.f32 %v471_v17  ;;  %v523_v15 = vld [vmem:[%s1151_s3 + $0x30] sm:$0xff] }
  0xa2   : > { %v861_v20 = vpop.eup %860  ;;  %v485_v23 = vmul.f32 %v859_v14, %v484_v18  ;;  %v451_v29 = vsel %vm450_vm15, %v853_v54, %v447_v21  ;;  %v397_v30 = vsub.f32 1.5, %v396_v22  ;;  %v521_v18 = vld [vmem:[%s1151_s3 + $0x20] sm:$0xff]  ;;  %v518_v21 = vld [vmem:[%s1151_s3 + $0x8] sm:$0xff] }
  0xa3   : > { %v408_v24 = vmul.f32 %v855_v59, %v407_v19  ;;  %v433_v25 = vmul.f32 %v861_v20, %v430_v61  ;;  %v453_v40 = vmul.f32 %v991_v8, %v451_v29  ;;  %vm439_vm7 = vweird.f32 %v861_v20  ;;  %v520_v19 = vld [vmem:[%s1151_s3 + $0x18] sm:$0xff]  ;;  %v517_v22 = vld [vmem:[%s1151_s3] sm:$0xff] }
  0xa4   : > { %v486_v26 = vmul.f32 0.5, %v485_v23  ;;  %v398_v42 = vmul.f32 %v1036_v62, %v397_v30  ;;  %vm440_vm10 = vmor %vm438_vm6, %vm439_vm7 }
  0xa5   : > { %v412_v27 = vsel %vm411_vm14, %v855_v59, %v408_v24  ;;  %v434_v28 = vmul.f32 %v861_v20, %v433_v25 }
  0xa6   : > { %v487_v31 = vsub.f32 1.5, %v486_v26  ;;  %v414_v34 = vmul.f32 %v993_v9, %v412_v27  ;;  %v402_v54 = vsel %vm401_vm9, %v1036_v62, %v398_v42 }
  0xa7   : > { %v863_v33 = vpop.eup %862  ;;  %v435_v35 = vmul.f32 0.5, %v434_v28  ;;  %v413_v58 = vmul.f32 %v993_v9, %v402_v54 }
  0xa8   : > { %v488_v36 = vmul.f32 %v859_v14, %v487_v31  ;;  %v474_v39 = vmul.f32 %v863_v33, %v471_v17  ;;  %v455_v46 = vadd.f32 %v453_v40, %v414_v34  ;;  %vm480_vm12 = vweird.f32 %v863_v33  ;;  %v522_v17 = vld [vmem:[%s1151_s3 + $0x28] sm:$0xff] }
  0xa9   : > { %v436_v41 = vsub.f32 1.5, %v435_v35  ;;  %vm481_vm13 = vmor %vm479_vm11, %vm480_vm12 }
  0xaa   : > { %v492_v43 = vsel %vm491_vm5, %v859_v14, %v488_v36  ;;  %v475_v44 = vmul.f32 %v863_v33, %v474_v39  ;;  %v524_v14 = vld [vmem:[%s1151_s3 + $0x38] sm:$0xff]  ;;  %vm514_vm5 = vcmask 687104  }
  0xab   : > { %v494_v47 = vmul.f32 %v1006_v16, %v492_v43  ;;  %v437_v48 = vmul.f32 %v861_v20, %v436_v41 }
  0xac   : > { %v476_v49 = vmul.f32 0.5, %v475_v44 }
  0xad   : > { %v441_v50 = vsel %vm440_vm10, %v861_v20, %v437_v48  ;;  %v496_v52 = vadd.f32 %v494_v47, %v455_v46  ;;  %v519_v20 = vld [vmem:[%s1151_s3 + $0x10] sm:$0xff]  ;;  %v368_v47 = vperm.slane %v1052_v45, 1 }
  0xae   : > { %v477_v55 = vsub.f32 1.5, %v476_v49  ;;  %v452_v56 = vmul.f32 %v991_v8, %v441_v50 }
  0xaf   : > { %v498_v57 = vmul.f32 %v496_v52, %v989_v6 }
  0xb0   : > { %v478_v51 = vmul.f32 %v863_v33, %v477_v55  ;;  %v454_v61 = vadd.f32 %v452_v56, %v413_v58  ;;  %v611_v58 = vld [vmem:[#allocation2 + $0x70] sm:$0xff] }
  0xb1   : > { %v1062_v59 = vmul.f32 %v499_v53, %v498_v57 }
  0xb2   : > { %v482_v60 = vsel %vm481_vm13, %v863_v33, %v478_v51 }
  0xb3   : > { %v493_v63 = vmul.f32 %v1006_v16, %v482_v60  ;;  %v503_v62 = vmul.f32 %v1062_v59, %v1062_v59  ;;  %v530_v16 = vld [vmem:[%s1151_s3 + $0x68] sm:$0xff] }
  0xb4   : > { %536 = vmatpush.msra.mxu0 %v530_v16  ;;  %795 = vmatpush.msra.mxu2 %v530_v16  ;;  %v610_v60 = vld [vmem:[#allocation2 + $0x68] sm:$0xff]  ;;  %v601_v16 = vld [vmem:[#allocation2 + $0x20] sm:$0xff] }
  0xb5   : > { %508 = vrot.lane.b32.xlu1 %v503_v62, %s923_s18  ;;  %v495_v0 = vadd.f32 %v493_v63, %v454_v61  ;;  %v608_v61 = vld [vmem:[#allocation2 + $0x58] sm:$0xff]  ;;  %v607_v63 = vld [vmem:[#allocation2 + $0x50] sm:$0xff]  ;;  %v606_v62 = vld [vmem:[#allocation2 + $0x48] sm:$0xff] }
  0xb6   : > { %537 = vmatpush.msra.mxu0 %v529_v5  ;;  %796 = vmatpush.msra.mxu2 %v529_v5  ;;  %v600_v5 = vld [vmem:[#allocation2 + $0x18] sm:$0xff] }
  0xb7   : > { %v497_v8 = vmul.f32 %v495_v0, %v995_v10  ;;  %v605_v0 = vld [vmem:[#allocation2 + $0x40] sm:$0xff] }
  0xb8   : > { %538 = vmatpush.msra.mxu0 %v528_v7  ;;  %797 = vmatpush.msra.mxu2 %v528_v7  ;;  %v599_v7 = vld [vmem:[#allocation2 + $0x10] sm:$0xff] }
  0xb9   : > { %v1068_v1 = vmul.f32 %v499_v53, %v497_v8  ;;  %v604_v8 = vld [vmem:[#allocation2 + $0x38] sm:$0xff] }
  0xba   : > { %539 = vmatpush.msra.mxu0 %v527_v11  ;;  %798 = vmatpush.msra.mxu2 %v527_v11  ;;  %v533_v11 = vperm.slane %v1052_v45, 3 }
  0xbb   : > { %v502_v9 = vmul.f32 %v1068_v1, %v1068_v1 }
  0xbc   : > { %540 = vmatpush.msra.mxu0 %v526_v12  ;;  %799 = vmatpush.msra.mxu2 %v526_v12  ;;  %v598_v12 = vld [vmem:[#allocation2 + $0x8] sm:$0xff] }
  0xbd   : > { %506 = vrot.lane.b32.xlu2 %v502_v9, %s923_s18  ;;  %v603_v9 = vld [vmem:[#allocation2 + $0x30] sm:$0xff] }
  0xbe   : > { %541 = vmatpush.msra.mxu0 %v525_v13  ;;  %800 = vmatpush.msra.mxu2 %v525_v13  ;;  %v597_v13 = vld [vmem:[#allocation2] sm:$0xff] }
  0xc0   : > { %542 = vmatpush.msra.mxu0 %v524_v14  ;;  %801 = vmatpush.msra.mxu2 %v524_v14 }
  0xc2   : > { %543 = vmatpush.msra.mxu0 %v523_v15  ;;  %802 = vmatpush.msra.mxu2 %v523_v15 }
  0xc4   : > { %544 = vmatpush.msra.mxu0 %v522_v17  ;;  %803 = vmatpush.msra.mxu2 %v522_v17 }
  0xc6   : > { %545 = vmatpush.msra.mxu0 %v521_v18  ;;  %804 = vmatpush.msra.mxu2 %v521_v18 }
  0xc8   : > { %546 = vmatpush.msra.mxu0 %v520_v19  ;;  %805 = vmatpush.msra.mxu2 %v520_v19 }
  0xca   : > { %547 = vmatpush.msra.mxu0 %v519_v20  ;;  %806 = vmatpush.msra.mxu2 %v519_v20 }
  0xcc   : > { %548 = vmatpush.msra.mxu0 %v518_v21  ;;  %807 = vmatpush.msra.mxu2 %v518_v21 }
  0xce   : > { %549 = vmatpush.msra.mxu0 %v517_v22  ;;  %808 = vmatpush.msra.mxu2 %v517_v22 }
 0x102   : > { %v335_v23 = vpop.xlane.xlu0 %334  ;;  %v338_v24 = vpop.xlane.xlu2 %337 }
 0x103   : > { %v339_v25 = vmul.f32 %v335_v23, %v1017_v32  ;;  %v340_v26 = vmul.f32 %v338_v24, %v1017_v32  ;;  %v365_v32 = vperm.slane %v1052_v45, 0 }
 0x105   : > { %v341_v27 = vadd.f32 1e-05, %v339_v25  ;;  %v342_v28 = vadd.f32 1e-05, %v340_v26 }
 0x107   : > { %864 = vrsqrt.f32 %v341_v27  ;;  %vm349_vm15 = vweird.f32 %v341_v27  ;;  %vm359_vm1 = vweird.f32 %v342_v28 }
 0x108   : > { %866 = vrsqrt.f32 %v342_v28 }
 0x10d   : > { %v865_v29 = vpop.eup %864 }
 0x10e   : > { %v867_v30 = vpop.eup %866  ;;  %v344_v31 = vmul.f32 %v865_v29, %v341_v27  ;;  %vm350_vm14 = vweird.f32 %v865_v29 }
 0x10f   : > { %v354_v33 = vmul.f32 %v867_v30, %v342_v28  ;;  %vm351_vm0 = vmor %vm349_vm15, %vm350_vm14  ;;  %vm360_vm3 = vweird.f32 %v867_v30 }
 0x110   : > { %v345_v34 = vmul.f32 %v865_v29, %v344_v31  ;;  %vm361_vm4 = vmor %vm359_vm1, %vm360_vm3 }
 0x111   : > { %v355_v35 = vmul.f32 %v867_v30, %v354_v33 }
 0x112   : > { %v346_v36 = vmul.f32 0.5, %v345_v34 }
 0x113   : > { %v356_v39 = vmul.f32 0.5, %v355_v35 }
 0x114   : > { %v347_v40 = vsub.f32 1.5, %v346_v36 }
 0x115   : > { %v357_v41 = vsub.f32 1.5, %v356_v39 }
 0x116   : > { %v348_v42 = vmul.f32 %v865_v29, %v347_v40 }
 0x117   : > { %v358_v43 = vmul.f32 %v867_v30, %v357_v41  ;;  %v507_v53 = vpop.permute.xlu2 %506 }
 0x118   : > { %v352_v44 = vsel %vm351_vm0, %v865_v29, %v348_v42 }
 0x119   : > { %v363_v46 = vmul.f32 %v352_v44, %v1025_v38  ;;  %v362_v48 = vsel %vm361_vm4, %v867_v30, %v358_v43  ;;  %v612_v38 = vld [vmem:[#allocation2 + $0x78] sm:$0xff] }
 0x11a   : > { %v364_v52 = vmul.f32 %v362_v48, %v1022_v37  ;;  %614 = vmatpush.msra.mxu1 %v612_v38  ;;  %809 = vmatpush.msra.mxu3 %v612_v38  ;;  %v609_v37 = vld [vmem:[#allocation2 + $0x60] sm:$0xff] }
 0x11b   : > { %v366_v49 = vmul.f32 %v365_v32, %v363_v46 }
 0x11c   : > { %v367_v55 = vmul.f32 %v365_v32, %v364_v52  ;;  %615 = vmatpush.msra.mxu1 %v611_v58  ;;  %810 = vmatpush.msra.mxu3 %v611_v58 }
 0x11d   : > { %v369_v50 = vadd.f32 %v368_v47, %v366_v49 }
 0x11e   : > { %v370_v56 = vadd.f32 %v368_v47, %v367_v55  ;;  %616 = vmatpush.msra.mxu1 %v610_v60  ;;  %811 = vmatpush.msra.mxu3 %v610_v60 }
 0x11f   : > { %v512_v54 = vsel %vm313_vm2, %v369_v50, %v507_v53  ;;  %v613_v50 = vperm.slane %v1052_v45, 4 }
 0x120   : > { %787 = vmatmul.msk.f32.vlgmr.msra.gmra.mxu0 %vm514_vm5, %v512_v54  ;;  %617 = vmatpush.msra.mxu1 %v609_v37 }
 0x121   : > { %812 = vmatpush.msra.mxu3 %v609_v37 }
 0x122   : > { %618 = vmatpush.msra.mxu1 %v608_v61 }
 0x123   : > { %813 = vmatpush.msra.mxu3 %v608_v61 }
 0x124   : > { %619 = vmatpush.msra.mxu1 %v607_v63 }
 0x125   : > { %814 = vmatpush.msra.mxu3 %v607_v63 }
 0x126   : > { %620 = vmatpush.msra.mxu1 %v606_v62 }
 0x127   : > { %v509_v57 = vpop.permute.xlu1 %508  ;;  %815 = vmatpush.msra.mxu3 %v606_v62 }
 0x128   : > { %v513_v51 = vsel %vm313_vm2, %v370_v56, %v509_v57  ;;  %621 = vmatpush.msra.mxu1 %v605_v0 }
 0x129   : > { %788 = vmatmul.msk.f32.vlgmr.msra.gmra.mxu2 %vm514_vm5, %v513_v51  ;;  %816 = vmatpush.msra.mxu3 %v605_v0 }
 0x12a   : > { %622 = vmatpush.msra.mxu1 %v604_v8 }
 0x12b   : > { %817 = vmatpush.msra.mxu3 %v604_v8 }
 0x12c   : > { %623 = vmatpush.msra.mxu1 %v603_v9 }
 0x12d   : > { %818 = vmatpush.msra.mxu3 %v603_v9 }
 0x12e   : > { %624 = vmatpush.msra.mxu1 %v602_v4 }
 0x12f   : > { %819 = vmatpush.msra.mxu3 %v602_v4 }
 0x130   : > { %625 = vmatpush.msra.mxu1 %v601_v16 }
 0x131   : > { %820 = vmatpush.msra.mxu3 %v601_v16 }
 0x132   : > { %626 = vmatpush.msra.mxu1 %v600_v5 }
 0x133   : > { %821 = vmatpush.msra.mxu3 %v600_v5 }
 0x134   : > { %627 = vmatpush.msra.mxu1 %v599_v7 }
 0x135   : > { %822 = vmatpush.msra.mxu3 %v599_v7 }
 0x136   : > { %628 = vmatpush.msra.mxu1 %v598_v12 }
 0x137   : > { %823 = vmatpush.msra.mxu3 %v598_v12 }
 0x138   : > { %629 = vmatpush.msra.mxu1 %v597_v13 }
 0x139   : > { %824 = vmatpush.msra.mxu3 %v597_v13 }
 0x19d   : > { %v551_v14 = vpop.f32.mrf.mxu0 }
 0x19e   : > { %v552_v15 = vadd.f32 %v551_v14, %v533_v11 }
 0x1a0   : > { %v789_v17 = vmul.f32 -1.442695, %v552_v15 }
 0x1a2   : > { %868 = vpow2.f32 %v789_v17 }
 0x1a8   : > { %v869_v18 = vpop.eup %868 }
 0x1a9   : > { %v563_v19 = vadd.f32 1.0, %v869_v18 }
 0x1ab   : > { %870 = vrcp.f32 %v563_v19  ;;  %v576_v26 = vand.u32 2147483648, %v563_v19  ;;  %v574_v28 = vand.u32 2147483647, %v563_v19  ;;  %vm570_vm7 = vweird.f32 %v563_v19 }
 0x1ac   : > { %v554_v20 = vpop.f32.mrf.mxu2 }
 0x1ad   : > { %v555_v21 = vadd.f32 %v554_v20, %v533_v11  ;;  %v577_v33 = vor.u32 1.1754944e-38, %v576_v26  ;;  %vm575_vm10 = vcmp.eq.f32.partialorder %v574_v28, 8.507059e+37 }
 0x1af   : > { %v790_v22 = vmul.f32 -1.442695, %v555_v21 }
 0x1b1   : > { %v871_v23 = vpop.eup %870  ;;  %872 = vpow2.f32 %v790_v22 }
 0x1b2   : > { %v566_v24 = vmul.f32 %v871_v23, %v563_v19  ;;  %vm571_vm6 = vweird.f32 %v871_v23 }
 0x1b3   : > { %vm572_vm9 = vmor %vm570_vm7, %vm571_vm6 }
 0x1b4   : > { %v567_v25 = vsub.f32 1.0, %v566_v24 }
 0x1b6   : > { %v568_v27 = vmul.f32 %v871_v23, %v567_v25 }
 0x1b7   : > { %v873_v29 = vpop.eup %872 }
 0x1b8   : > { %v564_v30 = vadd.f32 1.0, %v873_v29  ;;  %v569_v31 = vadd.f32 %v871_v23, %v568_v27 }
 0x1ba   : > { %874 = vrcp.f32 %v564_v30  ;;  %v573_v34 = vsel %vm572_vm9, %v871_v23, %v569_v31  ;;  %v591_v42 = vand.u32 2147483648, %v564_v30  ;;  %v589_v32 = vand.u32 2147483647, %v564_v30 }
 0x1bb   : > { %v578_v35 = vsel %vm575_vm10, %v577_v33, %v573_v34  ;;  %vm585_vm12 = vweird.f32 %v564_v30 }
 0x1bc   : > { %v595_v36 = vmul.f32 %v578_v35, %v552_v15  ;;  %v592_v46 = vor.u32 1.1754944e-38, %v591_v42  ;;  %vm590_vm14 = vcmp.eq.f32.partialorder %v589_v32, 8.507059e+37 }
 0x1be   : > { %630 = vmatmul.f32.vlgmr.msra.gmra.mxu1 %v595_v36 }
 0x1c0   : > { %v875_v39 = vpop.eup %874 }
 0x1c1   : > { %v581_v40 = vmul.f32 %v875_v39, %v564_v30  ;;  %vm586_vm11 = vweird.f32 %v875_v39 }
 0x1c2   : > { %vm587_vm13 = vmor %vm585_vm12, %vm586_vm11 }
 0x1c3   : > { %v582_v41 = vsub.f32 1.0, %v581_v40 }
 0x1c5   : > { %v583_v43 = vmul.f32 %v875_v39, %v582_v41 }
 0x1c7   : > { %v584_v44 = vadd.f32 %v875_v39, %v583_v43 }
 0x1c9   : > { %v588_v47 = vsel %vm587_vm13, %v875_v39, %v584_v44 }
 0x1ca   : > { %v593_v48 = vsel %vm590_vm14, %v592_v46, %v588_v47 }
 0x1cb   : > { %v596_v49 = vmul.f32 %v593_v48, %v555_v21 }
 0x1cd   : > { %633 = vmatmul.f32.vlgmr.msra.gmra.mxu3 %v596_v49 }
 0x23b   : > { %v631_v52 = vpop.f32.mrf.mxu1 }
 0x23c   : > { %v632_v53 = vadd.f32 %v631_v52, %v613_v50 }
 0x23e   : > { %v637_v54 = vadd.f32 %v632_v53, %v979_v3  ;;  %643 = vrot.lane.b32.xlu0 %v632_v53, %s924_s8 }
 0x240   : > { %639 = vst.msk [vmem:[%s300_s30] sm:$0xff] %vm313_vm2, %v637_v54 }
 0x250   : > { %v634_v55 = vpop.f32.mrf.mxu3 }
 0x251   : > { %v635_v56 = vadd.f32 %v634_v55, %v613_v50 }
 0x253   : > { %v638_v57 = vadd.f32 %v635_v56, %v977_v2  ;;  %645 = vrot.lane.b32.xlu2 %v635_v56, %s924_s8 }
 0x255   : > { %640 = vst.msk [vmem:[%s300_s30 + $0x8] sm:$0xff] %vm313_vm2, %v638_v57 }
 0x2ad   : > { %v646_v45 = vpop.permute.xlu2 %645 }
 0x2ae   : > { %v650_v51 = vmul.f32 %v646_v45, %v1062_v59 }
 0x2b0   : > { %v644_v38 = vpop.permute.xlu0 %643  ;;  %v652_v60 = vadd.f32 %v650_v51, %v989_v6 }
 0x2b1   : > { %v649_v58 = vmul.f32 %v644_v38, %v1068_v1 }
 0x2b2   : > { %654 = vst.msk [vmem:[%s306_s11 + $0x8] sm:$0xff] %vm382_vm8, %v652_v60 }
 0x2b3   : > { %v651_v3 = vadd.f32 %v649_v58, %v995_v10 }
 0x2b5   : > { %653 = vst.msk [vmem:[%s306_s11] sm:$0xff] %vm382_vm8, %v651_v3 }
 0x2b6 PF: > { %s18_s21 = sadd.s32 1, %s916_s21  }
 0x2b7   : > { %p15_p7 = scmp.ge.s32.totalorder %s18_s21, 6  }
 0x2b9   :  { %17 = sbr.rel (!%p15_p7) target bundleno = 1 (0x1), region = 90 }
 0x2be   :  { %694 = vsyncpa [#allocation3], 1 }
 0x2bf   :  { %696 = vsyncpa [#allocation3 + $0x1], 1 }

</bundles_post_ra>
